<compile_context>
chip_gen: v7x
topology: tpu7x:2x2x1
jax: 0.10.0
libtpu: 0.0.40
codegen_flags: <defaults>
</compile_context>

<pallas_src>
import functools

import jax
import jax.numpy as jnp
from jax.experimental import pallas as pl
from jax.experimental.pallas import tpu as pltpu


def _temporal_conv_kernel(x_ref, w_ref, b_ref, o_ref, *, Kt, T_out):
    """Processes a block of `Bb` batch rows in one invocation.

    x_ref : (Bb, T, N*c_in)          activations (incoming dtype, no extra cast pass)
    w_ref : (Kt, N*c_in, N*c_out)    block-diagonal per-tap weights, Align folded
                                     into tap Kt-1 (f32)
    b_ref : (1, N*c_out)             fused bias, tiled per vertex (f32)
    o_ref : (Bb, T_out, N*c_out)     output, lane-dense last dim
    """
    bias = b_ref[...]                                   # (1, N*c_out), f32
    Bb = x_ref.shape[0]
    n_cout = o_ref.shape[-1]

    for b in range(Bb):                                 # static unroll (Bb small)
        xb = x_ref[b]                                   # (T, N*c_in)
        acc = jnp.zeros((T_out, n_cout), dtype=jnp.float32)
        # Kt is small & static -> unrolled.  Each tap is one 2-D MXU dot with a
        # 64-wide contraction and a full-lane (128) output; shifted time slices
        # are static sublane sub-slices of the loaded value.
        for k in range(Kt):
            acc = acc + jnp.dot(xb[k:k + T_out, :], w_ref[k],
                                preferred_element_type=jnp.float32)
        acc = acc + bias                                # f32 bias add
        o_ref[b] = jnp.maximum(acc, 0.0).astype(o_ref.dtype)   # lane-dense store


def temporal_conv_layer(x, w_temp, b_temp, w_align, b_align, Kt, *,
                        batch_block=None):
    """x: [B, T, N, c_in] -> [B, T-Kt+1, N, c_out]  (relu(conv + align))."""
    B, T, N, c_in = x.shape
    c_out = w_temp.shape[-1]
    T_out = T - Kt + 1

    if batch_block is None:
        # Single grid step: at small shapes the kernel is bound by per-step
        # overhead, not MXU/HBM.  Use batch_block=1 on v7x (2 TCs) at larger B.
        batch_block = B
    assert B % batch_block == 0

    # --- Fuse Align into the last temporal tap (exact: same x slice, relu path). ---
    w_fused = w_temp.at[Kt - 1].add(w_align.astype(w_temp.dtype))       # (Kt, c_in, c_out)
    b_fused = (b_temp + b_align).astype(jnp.float32)                    # (c_out,)

    # --- Block-diagonal per-vertex packing for a lane-dense (N*c_out) output. ---
    eye_n = jnp.eye(N, dtype=w_fused.dtype)
    w_blk = jnp.stack([jnp.kron(eye_n, w_fused[k]) for k in range(Kt)], axis=0)
    # w_blk: (Kt, N*c_in, N*c_out);  block (n, n) of tap k == w_fused[k]
    b_blk = jnp.tile(b_fused, N).reshape(1, N * c_out)                  # (1, N*c_out)

    # Free (contiguous) HBM reshape; NO dtype cast -> no extra HBM pass over x.
    x_flat = x.reshape(B, T, N * c_in)

    kernel = functools.partial(_temporal_conv_kernel, Kt=Kt, T_out=T_out)

    out = pl.pallas_call(
        kernel,
        out_shape=jax.ShapeDtypeStruct((B, T_out, N * c_out), x.dtype),
        grid_spec=pltpu.PrefetchScalarGridSpec(
            num_scalar_prefetch=0,
            grid=(B // batch_block,),
            in_specs=[
                pl.BlockSpec((batch_block, T, N * c_in), lambda i: (i, 0, 0)),
                # Constant index maps -> weights/bias stay VMEM-resident across steps.
                pl.BlockSpec((Kt, N * c_in, N * c_out), lambda i: (0, 0, 0)),
                pl.BlockSpec((1, N * c_out), lambda i: (0, 0)),
            ],
            out_specs=pl.BlockSpec((batch_block, T_out, N * c_out),
                                   lambda i: (i, 0, 0)),
        ),
        compiler_params=pltpu.CompilerParams(
            dimension_semantics=("parallel",),
            # Tiny tiles; safe budget on all generations (v7x: 64 MiB physical).
            vmem_limit_bytes=32 * 1024 * 1024,
        ),
    )(x_flat, w_blk, b_blk)

    return out.reshape(B, T_out, N, c_out)


def make_align_params(c_in, c_out, key, dtype=jnp.float32):
    """Fold Align into a single (c_in, c_out) projection + bias."""
    if c_in == c_out:
        return jnp.eye(c_in, dtype=dtype), jnp.zeros((c_out,), dtype)
    elif c_in < c_out:
        # torch.cat([x, zeros]) along channel == x @ [I | 0]
        w = jnp.zeros((c_in, c_out), dtype).at[:, :c_in].set(jnp.eye(c_in, dtype=dtype))
        return w, jnp.zeros((c_out,), dtype)
    else:
        # 1x1 Conv2d(c_in -> c_out): weight [c_out, c_in, 1, 1] -> matmul
        kw, kb = jax.random.split(key)
        w_conv = jax.random.normal(kw, (c_out, c_in), dtype) * 0.1
        b_conv = jax.random.normal(kb, (c_out,), dtype) * 0.1
        return w_conv.T, b_conv


def reference_forward(x, w_temp, b_temp, w_align, b_align, Kt):
    """Pure-JAX f32 reference of the module math (exact einsums)."""
    T = x.shape[1]
    T_out = T - Kt + 1
    hi = jax.lax.Precision.HIGHEST
    conv = sum(
        jnp.einsum("btnc,cd->btnd", x[:, k:k + T_out], w_temp[k], precision=hi)
        for k in range(Kt)
    ) + b_temp
    x_in = jnp.einsum("btnc,cd->btnd", x[:, Kt - 1:Kt - 1 + T_out], w_align,
                      precision=hi) + b_align
    return jnp.maximum(conv + x_in, 0.0)


if __name__ == "__main__":
    # Small shapes consistent with the module: x = [B, T, N, c_in]
    B, T, N = 2, 8, 16
    c_in, c_out, Kt = 4, 8, 3  # c_in < c_out exercises the zero-pad Align branch
    dtype = jnp.float32

    key = jax.random.PRNGKey(0)
    kx, kw, kb, ka = jax.random.split(key, 4)

    x = jax.random.normal(kx, (B, T, N, c_in), dtype)

    # tempconv: PyTorch Conv2d weight [c_out, c_in, Kt, 1] -> [Kt, c_in, c_out]
    w_torch = jax.random.normal(kw, (c_out, c_in, Kt, 1), dtype) * 0.1
    w_temp = jnp.transpose(w_torch[:, :, :, 0], (2, 1, 0))  # (Kt, c_in, c_out)
    b_temp = jax.random.normal(kb, (c_out,), dtype) * 0.1

    w_align, b_align = make_align_params(c_in, c_out, ka, dtype)

    out = temporal_conv_layer(x, w_temp, b_temp, w_align, b_align, Kt)
    out = jax.block_until_ready(out)

    T_out = T - Kt + 1
    assert out.shape == (B, T_out, N, c_out), out.shape

    # Full-precision module reference.  The kernel keeps everything in f32
    # (no bf16 storage anymore); the only remaining difference is the MXU's
    # default f32 matmul pass precision, so the tolerance can be tight-ish.
    ref_full = reference_forward(x, w_temp, b_temp, w_align, b_align, Kt)
    assert jnp.allclose(out, ref_full, atol=1e-2, rtol=1e-2), \
        "mismatch vs full-precision module reference"

    print("KERNEL_OK")
</pallas_src>

<mosaic_0001>
module attributes {stable_mosaic.version = 11 : i64} {
  func.func @_temporal_conv_kernel(%arg0: i32, %arg1: memref<2x8x64xf32, #tpu.memory_space<vmem>>, %arg2: memref<3x64x128xf32, #tpu.memory_space<vmem>>, %arg3: memref<1x128xf32, #tpu.memory_space<vmem>>, %arg4: memref<2x6x128xf32, #tpu.memory_space<vmem>>) attributes {dimension_semantics = [#tpu.dimension_semantics<parallel>], iteration_bounds = array<i64: 1>, scalar_prefetch = 0 : i64, scratch_operands = 0 : i64, tpu.core_type = #tpu.core_type<tc>, window_params = [{transform_indices = @transform_0, window_bounds = array<i64: 2, 8, 64>}, {pipeline_mode = #tpu.pipeline_mode<synchronous>, transform_indices = @transform_1, window_bounds = array<i64: 3, 64, 128>}, {pipeline_mode = #tpu.pipeline_mode<synchronous>, transform_indices = @transform_2, window_bounds = array<i64: 1, 128>}, {transform_indices = @transform_3, window_bounds = array<i64: 2, 6, 128>}]} {
    %c0 = arith.constant 0 : index
    %c0_0 = arith.constant 0 : index
    %0 = vector.load %arg3[%c0, %c0_0] : memref<1x128xf32, #tpu.memory_space<vmem>>, vector<1x128xf32>
    %c0_1 = arith.constant 0 : index
    %c0_2 = arith.constant 0 : index
    %c0_3 = arith.constant 0 : index
    %1 = vector.load %arg1[%c0_1, %c0_2, %c0_3] : memref<2x8x64xf32, #tpu.memory_space<vmem>>, vector<1x8x64xf32>
    %2 = vector.shape_cast %1 : vector<1x8x64xf32> to vector<8x64xf32>
    %cst = arith.constant 0.000000e+00 : f32
    %3 = vector.broadcast %cst : f32 to vector<6x128xf32>
    %4 = vector.extract_strided_slice %2 {offsets = [0, 0], sizes = [6, 64], strides = [1, 1]} : vector<8x64xf32> to vector<6x64xf32>
    %c0_4 = arith.constant 0 : index
    %c0_5 = arith.constant 0 : index
    %c0_6 = arith.constant 0 : index
    %5 = vector.load %arg2[%c0_4, %c0_5, %c0_6] : memref<3x64x128xf32, #tpu.memory_space<vmem>>, vector<1x64x128xf32>
    %6 = vector.shape_cast %5 : vector<1x64x128xf32> to vector<64x128xf32>
    %cst_7 = arith.constant dense<0.000000e+00> : vector<6x128xf32>
    %7 = tpu.matmul %4, %6, %cst_7 {dimension_numbers = #tpu.dot_dimension_numbers<[1], [0], [0], [1], [0, 0, 1, 1], [], []>} : vector<6x64xf32>, vector<64x128xf32>, vector<6x128xf32> -> vector<6x128xf32>
    %8 = arith.addf %3, %7 : vector<6x128xf32>
    %9 = vector.extract_strided_slice %2 {offsets = [1, 0], sizes = [6, 64], strides = [1, 1]} : vector<8x64xf32> to vector<6x64xf32>
    %c1 = arith.constant 1 : index
    %c0_8 = arith.constant 0 : index
    %c0_9 = arith.constant 0 : index
    %10 = vector.load %arg2[%c1, %c0_8, %c0_9] : memref<3x64x128xf32, #tpu.memory_space<vmem>>, vector<1x64x128xf32>
    %11 = vector.shape_cast %10 : vector<1x64x128xf32> to vector<64x128xf32>
    %cst_10 = arith.constant dense<0.000000e+00> : vector<6x128xf32>
    %12 = tpu.matmul %9, %11, %cst_10 {dimension_numbers = #tpu.dot_dimension_numbers<[1], [0], [0], [1], [0, 0, 1, 1], [], []>} : vector<6x64xf32>, vector<64x128xf32>, vector<6x128xf32> -> vector<6x128xf32>
    %13 = arith.addf %8, %12 : vector<6x128xf32>
    %14 = vector.extract_strided_slice %2 {offsets = [2, 0], sizes = [6, 64], strides = [1, 1]} : vector<8x64xf32> to vector<6x64xf32>
    %c2 = arith.constant 2 : index
    %c0_11 = arith.constant 0 : index
    %c0_12 = arith.constant 0 : index
    %15 = vector.load %arg2[%c2, %c0_11, %c0_12] : memref<3x64x128xf32, #tpu.memory_space<vmem>>, vector<1x64x128xf32>
    %16 = vector.shape_cast %15 : vector<1x64x128xf32> to vector<64x128xf32>
    %cst_13 = arith.constant dense<0.000000e+00> : vector<6x128xf32>
    %17 = tpu.matmul %14, %16, %cst_13 {dimension_numbers = #tpu.dot_dimension_numbers<[1], [0], [0], [1], [0, 0, 1, 1], [], []>} : vector<6x64xf32>, vector<64x128xf32>, vector<6x128xf32> -> vector<6x128xf32>
    %18 = arith.addf %13, %17 : vector<6x128xf32>
    %19 = vector.broadcast %0 : vector<1x128xf32> to vector<6x128xf32>
    %20 = arith.addf %18, %19 : vector<6x128xf32>
    %cst_14 = arith.constant 0.000000e+00 : f32
    %21 = vector.broadcast %cst_14 : f32 to vector<6x128xf32>
    %22 = arith.maximumf %20, %21 : vector<6x128xf32>
    %c0_15 = arith.constant 0 : index
    %c0_16 = arith.constant 0 : index
    %c0_17 = arith.constant 0 : index
    %23 = vector.load %arg4[%c0_15, %c0_16, %c0_17] : memref<2x6x128xf32, #tpu.memory_space<vmem>>, vector<1x6x128xf32>
    %24 = vector.shape_cast %23 : vector<1x6x128xf32> to vector<6x128xf32>
    %25 = vector.shape_cast %22 : vector<6x128xf32> to vector<1x6x128xf32>
    tpu.vector_store %arg4[%c0_15, %c0_16, %c0_17], %25 {strides = array<i32>} : memref<2x6x128xf32, #tpu.memory_space<vmem>>, vector<1x6x128xf32>,
    %c1_18 = arith.constant 1 : index
    %c0_19 = arith.constant 0 : index
    %c0_20 = arith.constant 0 : index
    %26 = vector.load %arg1[%c1_18, %c0_19, %c0_20] : memref<2x8x64xf32, #tpu.memory_space<vmem>>, vector<1x8x64xf32>
    %27 = vector.shape_cast %26 : vector<1x8x64xf32> to vector<8x64xf32>
    %cst_21 = arith.constant 0.000000e+00 : f32
    %28 = vector.broadcast %cst_21 : f32 to vector<6x128xf32>
    %29 = vector.extract_strided_slice %27 {offsets = [0, 0], sizes = [6, 64], strides = [1, 1]} : vector<8x64xf32> to vector<6x64xf32>
    %c0_22 = arith.constant 0 : index
    %c0_23 = arith.constant 0 : index
    %c0_24 = arith.constant 0 : index
    %30 = vector.load %arg2[%c0_22, %c0_23, %c0_24] : memref<3x64x128xf32, #tpu.memory_space<vmem>>, vector<1x64x128xf32>
    %31 = vector.shape_cast %30 : vector<1x64x128xf32> to vector<64x128xf32>
    %cst_25 = arith.constant dense<0.000000e+00> : vector<6x128xf32>
    %32 = tpu.matmul %29, %31, %cst_25 {dimension_numbers = #tpu.dot_dimension_numbers<[1], [0], [0], [1], [0, 0, 1, 1], [], []>} : vector<6x64xf32>, vector<64x128xf32>, vector<6x128xf32> -> vector<6x128xf32>
    %33 = arith.addf %28, %32 : vector<6x128xf32>
    %34 = vector.extract_strided_slice %27 {offsets = [1, 0], sizes = [6, 64], strides = [1, 1]} : vector<8x64xf32> to vector<6x64xf32>
    %c1_26 = arith.constant 1 : index
    %c0_27 = arith.constant 0 : index
    %c0_28 = arith.constant 0 : index
    %35 = vector.load %arg2[%c1_26, %c0_27, %c0_28] : memref<3x64x128xf32, #tpu.memory_space<vmem>>, vector<1x64x128xf32>
    %36 = vector.shape_cast %35 : vector<1x64x128xf32> to vector<64x128xf32>
    %cst_29 = arith.constant dense<0.000000e+00> : vector<6x128xf32>
    %37 = tpu.matmul %34, %36, %cst_29 {dimension_numbers = #tpu.dot_dimension_numbers<[1], [0], [0], [1], [0, 0, 1, 1], [], []>} : vector<6x64xf32>, vector<64x128xf32>, vector<6x128xf32> -> vector<6x128xf32>
    %38 = arith.addf %33, %37 : vector<6x128xf32>
    %39 = vector.extract_strided_slice %27 {offsets = [2, 0], sizes = [6, 64], strides = [1, 1]} : vector<8x64xf32> to vector<6x64xf32>
    %c2_30 = arith.constant 2 : index
    %c0_31 = arith.constant 0 : index
    %c0_32 = arith.constant 0 : index
    %40 = vector.load %arg2[%c2_30, %c0_31, %c0_32] : memref<3x64x128xf32, #tpu.memory_space<vmem>>, vector<1x64x128xf32>
    %41 = vector.shape_cast %40 : vector<1x64x128xf32> to vector<64x128xf32>
    %cst_33 = arith.constant dense<0.000000e+00> : vector<6x128xf32>
    %42 = tpu.matmul %39, %41, %cst_33 {dimension_numbers = #tpu.dot_dimension_numbers<[1], [0], [0], [1], [0, 0, 1, 1], [], []>} : vector<6x64xf32>, vector<64x128xf32>, vector<6x128xf32> -> vector<6x128xf32>
    %43 = arith.addf %38, %42 : vector<6x128xf32>
    %44 = vector.broadcast %0 : vector<1x128xf32> to vector<6x128xf32>
    %45 = arith.addf %43, %44 : vector<6x128xf32>
    %cst_34 = arith.constant 0.000000e+00 : f32
    %46 = vector.broadcast %cst_34 : f32 to vector<6x128xf32>
    %47 = arith.maximumf %45, %46 : vector<6x128xf32>
    %c1_35 = arith.constant 1 : index
    %c0_36 = arith.constant 0 : index
    %c0_37 = arith.constant 0 : index
    %48 = vector.load %arg4[%c1_35, %c0_36, %c0_37] : memref<2x6x128xf32, #tpu.memory_space<vmem>>, vector<1x6x128xf32>
    %49 = vector.shape_cast %48 : vector<1x6x128xf32> to vector<6x128xf32>
    %50 = vector.shape_cast %47 : vector<6x128xf32> to vector<1x6x128xf32>
    tpu.vector_store %arg4[%c1_35, %c0_36, %c0_37], %50 {strides = array<i32>} : memref<2x6x128xf32, #tpu.memory_space<vmem>>, vector<1x6x128xf32>,
    return
  }
  func.func @transform_0(%arg0: i32) -> (i32, i32, i32) {
    %c0_i32 = arith.constant 0 : i32
    %c0_i32_0 = arith.constant 0 : i32
    %c0_i32_1 = arith.constant 0 : i32
    return %arg0, %c0_i32, %c0_i32_0 : i32, i32, i32
  }
  func.func @transform_1(%arg0: i32) -> (i32, i32, i32) {
    %c0_i32 = arith.constant 0 : i32
    %c0_i32_0 = arith.constant 0 : i32
    %c0_i32_1 = arith.constant 0 : i32
    %c0_i32_2 = arith.constant 0 : i32
    return %c0_i32, %c0_i32_0, %c0_i32_1 : i32, i32, i32
  }
  func.func @transform_2(%arg0: i32) -> (i32, i32) {
    %c0_i32 = arith.constant 0 : i32
    %c0_i32_0 = arith.constant 0 : i32
    %c0_i32_1 = arith.constant 0 : i32
    return %c0_i32, %c0_i32_0 : i32, i32
  }
  func.func @transform_3(%arg0: i32) -> (i32, i32, i32) {
    %c0_i32 = arith.constant 0 : i32
    %c0_i32_0 = arith.constant 0 : i32
    %c0_i32_1 = arith.constant 0 : i32
    return %arg0, %c0_i32, %c0_i32_0 : i32, i32, i32
  }
}

</mosaic_0001>

<bundles_post_ra>
// kernel: tpu_custom_call.1
= control target key start
LH: loop header
LB: loop body
LE: loop exit
PB: predicated region body
PF: predicated region fallthrough
CT: control target
= control target key end

     0   :  { %8 = vsyncpa [#allocation3], 0  ;;  %s973_s0 = inlined_call_operand.hbm [shape: f32[2,8,64], index: 0, kind: input, shape index: {}]   ;;  %s974_s1 = inlined_call_operand.hbm [shape: f32[3,64,128], index: 1, kind: input, shape index: {}]   ;;  %s975_s2 = inlined_call_operand.vmem [shape: f32[1,128], index: 2, kind: input, shape index: {}]   ;;  %s976_s3 = inlined_call_operand.vmem [shape: f32[2,6,128], index: 3, kind: output, shape index: {}]  }
   0x1   :  { %9 = vsyncpa [#allocation5], 0  ;;  %s859_s12 = smov [#allocation2]   ;;  %s811_s16 = scalar_lea.hbm %s973_s0, 256 }
   0x2   :  { %s15_s13 = sshll.u32 %s859_s12, 4  ;;  %p812_p0 = scmp.ne.s32.totalorder %s973_s0, %s811_s16  ;;  %s16_s13 = int_to_ptr.vmem [resolvable:$true] %s15_s13 }
   0x3   :  { %p815_p1 = scmp.lt.u32.totalorder %s811_s16, %s973_s0 }
   0x5   :  { %p817_p2 = pnand %p815_p1, %p812_p0 }
   0x7   :  { %820 = shalt.err (!%p817_p2)
}
   0x8   :  { %s821_s21 = scalar_lea.vmem %s16_s13, 256  ;;  %p826_p4 = scmp.lt.s32.totalorder %s16_s13, %s16_s13 }
   0x9   :  { %p822_p3 = scmp.ne.s32.totalorder %s16_s13, %s821_s21  ;;  %p827_p5 = scmp.lt.s32.totalorder %s821_s21, %s821_s21 }
   0xb   :  { %p828_p6 = por %p827_p5, %p826_p4 }
   0xd   :  { %p829_p7 = pnand %p828_p6, %p822_p3 }
   0xf   :  { %832 = shalt.err (!%p829_p7)
}
  0x10   :  { %s860_s22 = smov 128   ;;  %s861_s23 = smov 8  }
  0x11   :  { %21 = dma.hbm_to_vmem [thread:$0]  %s973_s0, 256, %s16_s13, [#allocation3], %s860_s22, %s860_s22, %s861_s23  }
  0x12   :  { %s862_s26 = smov [#allocation4]   ;;  %s833_s30 = scalar_lea.hbm %s974_s1, 3072 }
  0x13   :  { %s27_s27 = sshll.u32 %s862_s26, 4  ;;  %p834_p8 = scmp.ne.s32.totalorder %s974_s1, %s833_s30  ;;  %s28_s27 = int_to_ptr.vmem [resolvable:$true] %s27_s27 }
  0x14   :  { %p837_p9 = scmp.lt.u32.totalorder %s833_s30, %s974_s1 }
  0x16   :  { %p839_p10 = pnand %p837_p9, %p834_p8 }
  0x18   :  { %842 = shalt.err (!%p839_p10)
}
  0x19   :  { %s843_s8 = scalar_lea.vmem %s28_s27, 3072  ;;  %p848_p12 = scmp.lt.s32.totalorder %s28_s27, %s28_s27 }
  0x1a   :  { %p844_p11 = scmp.ne.s32.totalorder %s28_s27, %s843_s8  ;;  %p849_p13 = scmp.lt.s32.totalorder %s843_s8, %s843_s8 }
  0x1c   :  { %p850_p0 = por %p849_p13, %p848_p12 }
  0x1e   :  { %p851_p1 = pnand %p850_p0, %p844_p11 }
  0x20   :  { %854 = shalt.err (!%p851_p1)
}
  0x21   :  { %33 = dma.hbm_to_vmem [thread:$0]  %s974_s1, 3072, %s28_s27, [#allocation5], %s860_s22, %s860_s22, %s861_s23  }
  0x22   :  { %855 = dma.done.wait [#allocation3], 256  }
  0x23   :  { %856 = vsyncadd [#allocation3], 4294967040 }
  0x24   :  { %857 = dma.done.wait [#allocation5], 3072  }
  0x25   :  { %858 = vsyncadd [#allocation5], 4294964224  ;;  %v863_v0 = vmov 0.0|0.0   ;;  %vm864_vm0 = vmmov 0   ;;  %v865_v1 = vmov 0.0   ;;  %v53_v2 = vld [vmem:[#allocation4 + $0x40] sm:$0xff] }
  0x26   :  { %732 = vmatprep.subr.bf16.mxu0 %v863_v0  ;;  %744 = vmatprep.subr.bf16.mxu1 %v863_v0  ;;  %v54_v3 = vld [vmem:[#allocation4 + $0x48] sm:$0xff]  ;;  %v44_v4 = vld [vmem:[#allocation4] sm:$0xff]  ;;  %v55_v7 = vld [vmem:[#allocation4 + $0x50] sm:$0xff]  ;;  %vm63_vm1 = vcmask 523264  }
  0x27   :  { %634 = vmatprep.mubr.msk.f32.mxu0 %vm864_vm0, %v865_v1  ;;  %653 = vmatprep.mubr.msk.f32.mxu1 %vm864_vm0, %v865_v1  ;;  %v733_v5 = vpack.c.bf16 %v54_v3, %v53_v2  ;;  %v45_v6 = vld [vmem:[#allocation4 + $0x8] sm:$0xff]  ;;  %v56_v8 = vld [vmem:[#allocation4 + $0x58] sm:$0xff]  ;;  %v46_v10 = vld [vmem:[#allocation4 + $0x10] sm:$0xff] }
  0x28   :  { %v916_v9 = vpack.c.bf16 %v45_v6, %v44_v4  ;;  %v47_v11 = vld [vmem:[#allocation4 + $0x18] sm:$0xff]  ;;  %v736_v12 = vpack.c.bf16 %v56_v8, %v55_v7  ;;  %v57_v14 = vld [vmem:[#allocation4 + $0x60] sm:$0xff]  ;;  %v58_v15 = vld [vmem:[#allocation4 + $0x68] sm:$0xff] }
  0x29   :  { %734 = vmatpush3.bf16.msra.mxu0 %v733_v5  ;;  %v920_v13 = vpack.c.bf16 %v47_v11, %v46_v10  ;;  %v48_v16 = vld [vmem:[#allocation4 + $0x20] sm:$0xff]  ;;  %v49_v17 = vld [vmem:[#allocation4 + $0x28] sm:$0xff]  ;;  %v739_v18 = vpack.c.bf16 %v58_v15, %v57_v14  ;;  %v59_v20 = vld [vmem:[#allocation4 + $0x70] sm:$0xff] }
  0x2a   :  { %746 = vmatpush3.bf16.msra.mxu1 %v916_v9  ;;  %735 = vmatprep.subr.bf16.mxu0 %v863_v0  ;;  %v925_v19 = vpack.c.bf16 %v49_v17, %v48_v16  ;;  %v60_v21 = vld [vmem:[#allocation4 + $0x78] sm:$0xff]  ;;  %v50_v22 = vld [vmem:[#allocation4 + $0x30] sm:$0xff]  ;;  %v209_v27 = vld [vmem:[#allocation4 + $0x80] sm:$0xff] }
  0x2b   :  { %747 = vmatprep.subr.bf16.mxu1 %v863_v0  ;;  %v51_v23 = vld [vmem:[#allocation4 + $0x38] sm:$0xff]  ;;  %v742_v24 = vpack.c.bf16 %v60_v21, %v59_v20  ;;  %v43_v25 = vld [vmem:[#allocation2] sm:$0xff]  ;;  %v210_v28 = vld [vmem:[#allocation4 + $0x88] sm:$0xff] }
  0x2c   :  { %v754_v26 = vpack.c.bf16 %v51_v23, %v50_v22  ;;  %v62_v29 = vrot.slane %v43_v25, 1  ;;  %v757_v30 = vpack.c.bf16 %v210_v28, %v209_v27  ;;  %v211_v31 = vld [vmem:[#allocation4 + $0x90] sm:$0xff]  ;;  %v212_v32 = vld [vmem:[#allocation4 + $0x98] sm:$0xff]  ;;  %v213_v34 = vld [vmem:[#allocation4 + $0xa0] sm:$0xff]  ;;  %v217_v41 = vrot.slane %v43_v25, 2 }
  0x2d   :  { %737 = vmatpush3.bf16.msra.mxu0 %v736_v12  ;;  %v760_v33 = vpack.c.bf16 %v212_v32, %v211_v31  ;;  %v214_v35 = vld [vmem:[#allocation4 + $0xa8] sm:$0xff]  ;;  %v215_v37 = vld [vmem:[#allocation4 + $0xb0] sm:$0xff]  ;;  %v216_v38 = vld [vmem:[#allocation4 + $0xb8] sm:$0xff] }
  0x2e   :  { %749 = vmatpush3.bf16.msra.mxu1 %v920_v13  ;;  %738 = vmatprep.subr.bf16.mxu0 %v863_v0  ;;  %v763_v36 = vpack.c.bf16 %v214_v35, %v213_v34  ;;  %v766_v39 = vpack.c.bf16 %v216_v38, %v215_v37  ;;  %v301_v40 = vld [vmem:[#allocation2 + $0x8] sm:$0xff]  ;;  %v559_v49 = vld [vmem:[%s975_s2] ss:$0 sm:$0xff] }
  0x2f   :  { %750 = vmatprep.subr.bf16.mxu1 %v863_v0  ;;  %v319_v42 = vrot.slane %v301_v40, 1  ;;  %v472_v43 = vrot.slane %v301_v40, 2 }
  0x31   :  { %740 = vmatpush3.bf16.msra.mxu0 %v739_v18 }
  0x32   :  { %752 = vmatpush3.bf16.msra.mxu1 %v925_v19  ;;  %741 = vmatprep.subr.bf16.mxu0 %v863_v0 }
  0x33   :  { %753 = vmatprep.subr.bf16.mxu1 %v863_v0 }
  0x35   :  { %743 = vmatpush3.bf16.msra.mxu0 %v742_v24 }
  0x36   :  { %755 = vmatpush3.bf16.msra.mxu1 %v754_v26  ;;  %756 = vmatprep.subr.bf16.mxu0 %v863_v0 }
  0x37   :  { %768 = vmatprep.subr.bf16.mxu1 %v863_v0 }
  0x38   :  { %635 = vmatmul.mubr.msk.f32.vlgmr.msra.gmra.mrb[0].mxu0 %vm63_vm1, %v62_v29 }
  0x39   :  { %654 = vmatmul.mubr.msk.f32.vlgmr.msra.gmra.mrb[0].mxu1 %vm63_vm1, %v43_v25  ;;  %758 = vmatpush3.bf16.msra.mxu0 %v757_v30 }
  0x3a   :  { %770 = vmatpush3.bf16.msra.mxu1 %v733_v5  ;;  %759 = vmatprep.subr.bf16.mxu0 %v863_v0 }
  0x3b   :  { %771 = vmatprep.subr.bf16.mxu1 %v863_v0  ;;  %672 = vmatprep.mubr.msk.f32.mxu0 %vm864_vm0, %v865_v1 }
  0x3c   :  { %691 = vmatprep.mubr.msk.f32.mxu1 %vm864_vm0, %v865_v1 }
  0x3d   :  { %761 = vmatpush3.bf16.msra.mxu0 %v760_v33 }
  0x3e   :  { %773 = vmatpush3.bf16.msra.mxu1 %v736_v12  ;;  %762 = vmatprep.subr.bf16.mxu0 %v863_v0 }
  0x3f   :  { %774 = vmatprep.subr.bf16.mxu1 %v863_v0 }
  0x41   :  { %764 = vmatpush3.bf16.msra.mxu0 %v763_v36 }
  0x42   :  { %776 = vmatpush3.bf16.msra.mxu1 %v739_v18  ;;  %765 = vmatprep.subr.bf16.mxu0 %v863_v0 }
  0x43   :  { %777 = vmatprep.subr.bf16.mxu1 %v863_v0 }
  0x45   :  { %767 = vmatpush3.bf16.msra.mxu0 %v766_v39 }
  0x46   :  { %779 = vmatpush3.bf16.msra.mxu1 %v742_v24  ;;  %780 = vmatprep.subr.bf16.mxu0 %v863_v0 }
  0x47   :  { %792 = vmatprep.subr.bf16.mxu1 %v863_v0 }
  0x48   :  { %673 = vmatmul.mubr.msk.f32.vlgmr.msra.gmra.mrb[2].mxu0 %vm63_vm1, %v217_v41 }
  0x49   :  { %782 = vmatpush3.bf16.msra.mxu0 %v916_v9  ;;  %692 = vmatmul.mubr.msk.f32.vlgmr.msra.gmra.mrb[2].mxu1 %vm63_vm1, %v319_v42 }
  0x4a   :  { %794 = vmatpush3.bf16.msra.mxu1 %v757_v30  ;;  %783 = vmatprep.subr.bf16.mxu0 %v863_v0 }
  0x4b   :  { %795 = vmatprep.subr.bf16.mxu1 %v863_v0  ;;  %710 = vmatprep.mubr.msk.f32.mxu0 %vm864_vm0, %v865_v1 }
  0x4c   :  { %729 = vmatprep.mubr.msk.f32.mxu1 %vm864_vm0, %v865_v1 }
  0x4d   :  { %785 = vmatpush3.bf16.msra.mxu0 %v920_v13 }
  0x4e   :  { %797 = vmatpush3.bf16.msra.mxu1 %v760_v33  ;;  %786 = vmatprep.subr.bf16.mxu0 %v863_v0 }
  0x4f   :  { %798 = vmatprep.subr.bf16.mxu1 %v863_v0 }
  0x51   :  { %788 = vmatpush3.bf16.msra.mxu0 %v925_v19 }
  0x52   :  { %800 = vmatpush3.bf16.msra.mxu1 %v763_v36  ;;  %789 = vmatprep.subr.bf16.mxu0 %v863_v0 }
  0x53   :  { %801 = vmatprep.subr.bf16.mxu1 %v863_v0 }
  0x55   :  { %791 = vmatpush3.bf16.msra.mxu0 %v754_v26 }
  0x56   :  { %803 = vmatpush3.bf16.msra.mxu1 %v766_v39 }
  0x58   :  { %711 = vmatmul.mubr.msk.f32.vlgmr.msra.gmra.mrb[4].mxu0 %vm63_vm1, %v301_v40 }
  0x59   :  { %730 = vmatmul.mubr.msk.f32.vlgmr.msra.gmra.mrb[4].mxu1 %vm63_vm1, %v472_v43 }
 0x10b   :  { %v132_v44 = vpop.f32.mrb[0].mxu0 }
 0x10c   :  { %v636_v45 = vpop.f32.mrb[1].mxu0  ;;  %v204_v46 = vpop.f32.mrb[0].mxu1 }
 0x10d   :  { %v205_v47 = vadd.f32 %v204_v46, %v132_v44  ;;  %v655_v48 = vpop.f32.mrb[1].mxu1 }
 0x11b   :  { %v286_v50 = vpop.f32.mrb[2].mxu0 }
 0x11c   :  { %v290_v51 = vadd.f32 %v286_v50, %v205_v47  ;;  %v674_v52 = vpop.f32.mrb[3].mxu0  ;;  %v388_v53 = vpop.f32.mrb[2].mxu1 }
 0x11d   :  { %v693_v54 = vpop.f32.mrb[3].mxu1 }
 0x11e   :  { %v297_v55 = vadd.f32 %v559_v49, %v290_v51 }
 0x120   :  { %v298_v56 = vmax.f32 %v297_v55, 0.0 }
 0x122   :  { %299 = vst [vmem:[%s976_s3] sm:$0x3f] %v298_v56 }
 0x12b   :  { %v460_v57 = vpop.f32.mrb[4].mxu0 }
 0x12c   :  { %v461_v58 = vadd.f32 %v460_v57, %v388_v53  ;;  %v712_v59 = vpop.f32.mrb[5].mxu0  ;;  %v541_v60 = vpop.f32.mrb[4].mxu1 }
 0x12d   :  { %v731_v61 = vpop.f32.mrb[5].mxu1 }
 0x12e   :  { %v545_v62 = vadd.f32 %v541_v60, %v461_v58 }
 0x130   :  { %v546_v63 = vadd.f32 %v559_v49, %v545_v62 }
 0x132   :  { %v547_v0 = vmax.f32 %v546_v63, 0.0 }
 0x134   :  { %563 = vst [vmem:[%s976_s3 + $0x8] sm:$0x3f] %v547_v0 }
 0x135   :  { %554 = vsyncpa [#allocation3], 1 }
 0x136   :  { %555 = vsyncpa [#allocation5], 1 }

</bundles_post_ra>
